<compile_context>
chip_gen: v7x
topology: tpu7x:2x2x1
jax: 0.10.0
libtpu: 0.0.40
codegen_flags: <defaults>
</compile_context>

<pallas_src>
import math
import functools

import jax
import jax.numpy as jnp
from jax.experimental import pallas as pl
from jax.experimental.pallas import tpu as pltpu


def _round_up(x: int, m: int) -> int:
    return ((x + m - 1) // m) * m


def _vmem_capacity_bytes() -> int:
    """Per-core VMEM capacity; conservative (v7x) fallback if query fails."""
    try:
        return int(pltpu.get_tpu_info().vmem_capacity_bytes)
    except Exception:
        return 64 * 1024 * 1024


# --------------------------------------------------------------------------
# Kernel body: one (i, j, k) grid step of the fused gated projection.
# --------------------------------------------------------------------------
def gated_kernel(x_ref, w_ref, b_ref, o_ref, acc_ref):
    """x_ref:(tm,tk)  w_ref:(tk,2*tn) interleaved [gate|proj]  b_ref:(1,2*tn) f32
    o_ref:(tm,tn)  acc_ref:(tm,2*tn) f32 scratch, resident across K."""
    k = pl.program_id(2)

    @pl.when(k == 0)
    def _():
        # Seed the accumulator with the broadcast fused bias: keeps the bias
        # add off the epilogue critical path.
        acc_ref[...] = jnp.broadcast_to(b_ref[...], acc_ref.shape)

    # Single fused MXU pass (bf16 or f32 inputs, f32 accumulation).
    acc_ref[...] += jnp.dot(
        x_ref[...], w_ref[...], preferred_element_type=jnp.float32
    )

    @pl.when(k == pl.num_programs(2) - 1)
    def _():
        tn = o_ref.shape[-1]
        z = acc_ref[...]                   # bias already folded in at k==0
        g = jax.nn.sigmoid(z[:, :tn])      # gate half (EUP)
        h = jnp.maximum(z[:, tn:], 0.0)    # proj half (VPU)
        o_ref[...] = (g * h).astype(o_ref.dtype)


# --------------------------------------------------------------------------
# One-time packing (init-time; NOT in the per-call jitted path).
# --------------------------------------------------------------------------
def choose_weight_tiles(input_dim: int, output_dim: int):
    """tn / tk depend only on the weight shape; fixed at pack time.

    Large tn keeps nb = Dout_p/tn small (ideally 1) so x is not re-streamed
    across many N blocks; caps chosen to fit v7x's 64 MiB/TC VMEM with
    double/triple buffering.
    """
    tk = min(1024, _round_up(input_dim, 128))
    tn = min(512, _round_up(output_dim, 128))
    return tn, tk


def pack_params(w_gate, b_gate, w_proj, b_proj, *, tn, tk,
                compute_dtype=jnp.bfloat16):
    """Pad + block-interleave the gate/proj weights ONCE.

    Lane-axis layout (width 2*Dout_p), block width tn:
      [gate_blk0 | proj_blk0 | gate_blk1 | proj_blk1 | ...]
    so every (tk, 2*tn) weight tile carries the matching gate/proj column
    pair and one MXU dot produces both halves.
    w_gate / w_proj are [D_in, D_out] (transpose of PyTorch's [out, in]).
    """
    d_in, d_out = w_gate.shape
    din_p = _round_up(d_in, tk)
    dout_p = _round_up(d_out, tn)
    nb = dout_p // tn

    wg = jnp.zeros((din_p, dout_p), compute_dtype).at[:d_in, :d_out].set(
        w_gate.astype(compute_dtype))
    wp = jnp.zeros((din_p, dout_p), compute_dtype).at[:d_in, :d_out].set(
        w_proj.astype(compute_dtype))
    w_cat = jnp.stack(
        [wg.reshape(din_p, nb, tn), wp.reshape(din_p, nb, tn)], axis=2
    ).reshape(din_p, 2 * dout_p)

    bg = jnp.zeros((dout_p,), jnp.float32).at[:d_out].set(
        b_gate.astype(jnp.float32))
    bp = jnp.zeros((dout_p,), jnp.float32).at[:d_out].set(
        b_proj.astype(jnp.float32))
    b_cat = jnp.stack(
        [bg.reshape(nb, tn), bp.reshape(nb, tn)], axis=1
    ).reshape(1, 2 * dout_p)

    return w_cat, b_cat


# --------------------------------------------------------------------------
# Per-call wrapper (pads x, runs the kernel, slices the result).
# --------------------------------------------------------------------------
@functools.partial(jax.jit, static_argnames=("d_out", "tn", "tk"))
def gated_mechanism(x, w_cat, b_cat, *, d_out, tn, tk):
    """x: [B, D_in]; w_cat/b_cat from pack_params. Returns [B, d_out]."""
    B, d_in = x.shape
    din_p, two_dout_p = w_cat.shape
    dout_p = two_dout_p // 2
    nb = dout_p // tn

    out_dtype = x.dtype
    mat_dtype = w_cat.dtype
    itemsize = jnp.dtype(mat_dtype).itemsize
    out_itemsize = jnp.dtype(out_dtype).itemsize
    sub = 8 if itemsize >= 4 else 16          # sublane multiple for the M axis

    # ---- M tile (batch-dependent, chosen per call) -------------------------
    tm = min(256, _round_up(B, sub))
    B_p = _round_up(B, tm)
    # v7x megacore: ensure >= 2 "parallel" (M, N) blocks when the batch allows
    # it, so both TensorCores get work (no effect on single-TC v5e/v6e).
    if (B_p // tm) * nb < 2 and _round_up(B, sub) >= 2 * sub:
        tm = _round_up(_round_up(B, sub) // 2, sub)
        B_p = _round_up(B, tm)

    # ---- pad + cast x (lane-dense, (8,128)-legal blocks) -------------------
    x_c = x.astype(mat_dtype)
    if (B_p, din_p) != (B, d_in):
        x_c = jnp.zeros((B_p, din_p), mat_dtype).at[:B, :d_in].set(x_c)

    grid = (B_p // tm, nb, din_p // tk)

    # ---- weight-stream buffering -------------------------------------------
    # Decode-style tiny tm: MXU work per tile is small, so deepen the weight
    # stream to hide DMA latency (only when there are >= 3 weight tiles).
    deep_weight_stream = (tm <= 64) and (grid[1] * grid[2] >= 3)
    if deep_weight_stream:
        w_spec = pl.BlockSpec((tk, 2 * tn), lambda i, j, k: (k, j),
                              pipeline_mode=pl.Buffered(3))
    else:
        w_spec = pl.BlockSpec((tk, 2 * tn), lambda i, j, k: (k, j))
    w_bufs = 3 if deep_weight_stream else 2

    # ---- VMEM budget (generation-aware via get_tpu_info) --------------------
    working_set = (2 * tm * tk * itemsize            # x tiles (double-buffered)
                   + w_bufs * tk * 2 * tn * itemsize  # fused weight tiles
                   + 2 * 2 * tn * 4                   # bias tiles (f32)
                   + 2 * tm * tn * out_itemsize       # output tiles
                   + tm * 2 * tn * 4)                 # f32 accumulator scratch
    vmem_cap = _vmem_capacity_bytes()
    vmem_limit = min(int(0.75 * vmem_cap), max(2 * working_set, 32 << 20))

    # ---- truthful cost hint (x re-read per N block, W re-read per M block) --
    cost = pl.CostEstimate(
        flops=2 * B_p * din_p * (2 * dout_p),
        transcendentals=B_p * dout_p,                  # sigmoid exp
        bytes_accessed=(grid[1] * B_p * din_p * itemsize
                        + grid[0] * din_p * 2 * dout_p * itemsize
                        + grid[0] * grid[1] * 2 * tn * 4
                        + B_p * dout_p * out_itemsize),
    )

    out_p = pl.pallas_call(
        gated_kernel,
        out_shape=jax.ShapeDtypeStruct((B_p, dout_p), out_dtype),
        grid_spec=pltpu.PrefetchScalarGridSpec(
            num_scalar_prefetch=0,
            grid=grid,
            in_specs=[
                # x tile: re-fetched per N block (nb is kept small — often 1 —
                # by choosing tn large at pack time).
                pl.BlockSpec((tm, tk), lambda i, j, k: (i, k)),
                # Fused [gate|proj] weight tile, streamed over K (innermost).
                w_spec,
                # Fused bias tile (f32), folded into the accumulator at k==0.
                pl.BlockSpec((1, 2 * tn), lambda i, j, k: (0, j)),
            ],
            out_specs=pl.BlockSpec((tm, tn), lambda i, j, k: (i, j)),
            scratch_shapes=[pltpu.VMEM((tm, 2 * tn), jnp.float32)],
        ),
        compiler_params=pltpu.CompilerParams(
            dimension_semantics=("parallel", "parallel", "arbitrary"),
            vmem_limit_bytes=vmem_limit,
        ),
        cost_estimate=cost,
    )(x_c, w_cat, b_cat)

    return out_p[:B, :d_out]


# --------------------------------------------------------------------------
# Init / reference (test harness).
# --------------------------------------------------------------------------
def init_params(key, input_dim, output_dim):
    """Deterministic init mirroring nn.Linear's U(-1/sqrt(in), 1/sqrt(in))."""
    k1, k2, k3, k4 = jax.random.split(key, 4)
    bound = 1.0 / math.sqrt(input_dim)
    # Stored as [D_in, D_out] (transpose of PyTorch's [out, in]).
    w_gate = jax.random.uniform(k1, (input_dim, output_dim), jnp.float32, -bound, bound)
    b_gate = jax.random.uniform(k2, (output_dim,), jnp.float32, -bound, bound)
    w_proj = jax.random.uniform(k3, (input_dim, output_dim), jnp.float32, -bound, bound)
    b_proj = jax.random.uniform(k4, (output_dim,), jnp.float32, -bound, bound)
    return w_gate, b_gate, w_proj, b_proj


def reference(x, w_gate, b_gate, w_proj, b_proj):
    g = jax.nn.sigmoid(x @ w_gate + b_gate)
    h = jnp.maximum(x @ w_proj + b_proj, 0.0)
    return g * h


if __name__ == "__main__":
    key = jax.random.PRNGKey(0)
    batch, input_dim, output_dim = 2, 32, 32

    kx, kp = jax.random.split(key)
    x = jax.random.normal(kx, (batch, input_dim), jnp.float32)
    w_gate, b_gate, w_proj, b_proj = init_params(kp, input_dim, output_dim)
    ref = reference(x, w_gate, b_gate, w_proj, b_proj)

    tn, tk = choose_weight_tiles(input_dim, output_dim)

    # Default path: bf16 matmul inputs, f32 accumulation + f32 epilogue.
    w_cat, b_cat = pack_params(w_gate, b_gate, w_proj, b_proj,
                               tn=tn, tk=tk, compute_dtype=jnp.bfloat16)
    out = gated_mechanism(x, w_cat, b_cat, d_out=output_dim, tn=tn, tk=tk)
    out = jax.block_until_ready(out)
    assert out.shape == (batch, output_dim)
    assert jnp.allclose(out, ref, atol=3e-2, rtol=3e-2)  # bf16 input rounding

    # Full-precision path: tight tolerance.
    w_cat32, b_cat32 = pack_params(w_gate, b_gate, w_proj, b_proj,
                                   tn=tn, tk=tk, compute_dtype=jnp.float32)
    out32 = gated_mechanism(x, w_cat32, b_cat32, d_out=output_dim, tn=tn, tk=tk)
    out32 = jax.block_until_ready(out32)
    assert jnp.allclose(out32, ref, atol=1e-5, rtol=1e-5)

    # TODO(synk): optional fp8 weight streaming with per-block scales on v7x.
    print("KERNEL_OK")
</pallas_src>

<mosaic_0001>
module attributes {stable_mosaic.version = 11 : i64} {
  func.func @gated_kernel(%arg0: i32, %arg1: i32, %arg2: i32, %arg3: memref<16x128xbf16, #tpu.memory_space<vmem>>, %arg4: memref<128x256xbf16, #tpu.memory_space<vmem>>, %arg5: memref<1x256xf32, #tpu.memory_space<vmem>>, %arg6: memref<16x128xf32, #tpu.memory_space<vmem>>, %arg7: memref<16x256xf32, #tpu.memory_space<vmem>>) attributes {dimension_semantics = [#tpu.dimension_semantics<parallel>, #tpu.dimension_semantics<parallel>, #tpu.dimension_semantics<arbitrary>], iteration_bounds = array<i64: 1, 1, 1>, scalar_prefetch = 0 : i64, scratch_operands = 1 : i64, tpu.core_type = #tpu.core_type<tc>, window_params = [{transform_indices = @transform_0, window_bounds = array<i64: 16, 128>}, {transform_indices = @transform_1, window_bounds = array<i64: 128, 256>}, {transform_indices = @transform_2, window_bounds = array<i64: 1, 256>}, {transform_indices = @transform_3, window_bounds = array<i64: 16, 128>}]} {
    %c0_i32 = arith.constant 0 : i32
    %0 = arith.cmpi eq, %arg2, %c0_i32 : i32
    %1 = arith.extui %0 : i1 to i32
    %c0_i32_0 = arith.constant 0 : i32
    %2 = arith.cmpi ne, %1, %c0_i32_0 : i32
    scf.if %2 {
      %c0_10 = arith.constant 0 : index
      %c0_11 = arith.constant 0 : index
      %12 = vector.load %arg5[%c0_10, %c0_11] : memref<1x256xf32, #tpu.memory_space<vmem>>, vector<1x256xf32>
      %13 = vector.shape_cast %12 : vector<1x256xf32> to vector<1x256xf32>
      %14 = vector.broadcast %13 : vector<1x256xf32> to vector<16x256xf32>
      %c0_12 = arith.constant 0 : index
      %c0_13 = arith.constant 0 : index
      %15 = vector.load %arg7[%c0_12, %c0_13] : memref<16x256xf32, #tpu.memory_space<vmem>>, vector<16x256xf32>
      tpu.vector_store %arg7[%c0_12, %c0_13], %14 {strides = array<i32>} : memref<16x256xf32, #tpu.memory_space<vmem>>, vector<16x256xf32>,
    } else {
    }
    %c0 = arith.constant 0 : index
    %c0_1 = arith.constant 0 : index
    %3 = vector.load %arg7[%c0, %c0_1] : memref<16x256xf32, #tpu.memory_space<vmem>>, vector<16x256xf32>
    %c0_2 = arith.constant 0 : index
    %c0_3 = arith.constant 0 : index
    %4 = vector.load %arg3[%c0_2, %c0_3] : memref<16x128xbf16, #tpu.memory_space<vmem>>, vector<16x128xbf16>
    %c0_4 = arith.constant 0 : index
    %c0_5 = arith.constant 0 : index
    %5 = vector.load %arg4[%c0_4, %c0_5] : memref<128x256xbf16, #tpu.memory_space<vmem>>, vector<128x256xbf16>
    %cst = arith.constant dense<0.000000e+00> : vector<16x256xf32>
    %6 = tpu.matmul %4, %5, %cst {dimension_numbers = #tpu.dot_dimension_numbers<[1], [0], [0], [1], [0, 0, 1, 1], [], []>} : vector<16x128xbf16>, vector<128x256xbf16>, vector<16x256xf32> -> vector<16x256xf32>
    %7 = arith.addf %3, %6 : vector<16x256xf32>
    %c0_6 = arith.constant 0 : index
    %c0_7 = arith.constant 0 : index
    %8 = vector.load %arg7[%c0_6, %c0_7] : memref<16x256xf32, #tpu.memory_space<vmem>>, vector<16x256xf32>
    tpu.vector_store %arg7[%c0_6, %c0_7], %7 {strides = array<i32>} : memref<16x256xf32, #tpu.memory_space<vmem>>, vector<16x256xf32>,
    %c0_i32_8 = arith.constant 0 : i32
    %9 = arith.cmpi eq, %arg2, %c0_i32_8 : i32
    %10 = arith.extui %9 : i1 to i32
    %c0_i32_9 = arith.constant 0 : i32
    %11 = arith.cmpi ne, %10, %c0_i32_9 : i32
    scf.if %11 {
      %c0_10 = arith.constant 0 : index
      %c0_11 = arith.constant 0 : index
      %12 = vector.load %arg7[%c0_10, %c0_11] : memref<16x256xf32, #tpu.memory_space<vmem>>, vector<16x256xf32>
      %13 = vector.extract_strided_slice %12 {offsets = [0, 0], sizes = [16, 128], strides = [1, 1]} : vector<16x256xf32> to vector<16x128xf32>
      %14 = arith.negf %13 : vector<16x128xf32>
      %15 = math.exp %14 : vector<16x128xf32>
      %cst_12 = arith.constant 1.000000e+00 : f32
      %16 = vector.broadcast %cst_12 : f32 to vector<16x128xf32>
      %17 = arith.addf %16, %15 : vector<16x128xf32>
      %18 = arith.divf %16, %17 : vector<16x128xf32>
      %19 = vector.extract_strided_slice %12 {offsets = [0, 128], sizes = [16, 128], strides = [1, 1]} : vector<16x256xf32> to vector<16x128xf32>
      %cst_13 = arith.constant 0.000000e+00 : f32
      %20 = vector.broadcast %cst_13 : f32 to vector<16x128xf32>
      %21 = arith.maximumf %19, %20 : vector<16x128xf32>
      %22 = arith.mulf %18, %21 : vector<16x128xf32>
      %c0_14 = arith.constant 0 : index
      %c0_15 = arith.constant 0 : index
      %23 = vector.load %arg6[%c0_14, %c0_15] : memref<16x128xf32, #tpu.memory_space<vmem>>, vector<16x128xf32>
      tpu.vector_store %arg6[%c0_14, %c0_15], %22 {strides = array<i32>} : memref<16x128xf32, #tpu.memory_space<vmem>>, vector<16x128xf32>,
    } else {
    }
    return
  }
  func.func @transform_0(%arg0: i32, %arg1: i32, %arg2: i32) -> (i32, i32) {
    %c0_i32 = arith.constant 0 : i32
    return %arg0, %arg2 : i32, i32
  }
  func.func @transform_1(%arg0: i32, %arg1: i32, %arg2: i32) -> (i32, i32) {
    %c0_i32 = arith.constant 0 : i32
    return %arg2, %arg1 : i32, i32
  }
  func.func @transform_2(%arg0: i32, %arg1: i32, %arg2: i32) -> (i32, i32) {
    %c0_i32 = arith.constant 0 : i32
    %c0_i32_0 = arith.constant 0 : i32
    return %c0_i32, %arg1 : i32, i32
  }
  func.func @transform_3(%arg0: i32, %arg1: i32, %arg2: i32) -> (i32, i32) {
    %c0_i32 = arith.constant 0 : i32
    return %arg0, %arg1 : i32, i32
  }
}

</mosaic_0001>

<bundles_post_ra>
// kernel: gated_mechanism.1
= control target key start
LH: loop header
LB: loop body
LE: loop exit
PB: predicated region body
PF: predicated region fallthrough
CT: control target
= control target key end

     0   :  { %8 = vsyncpa [#allocation4], 0  ;;  %s318_s12 = smov [#allocation3]   ;;  %s366_s0 = inlined_call_operand.vmem [shape: bf16[16,128], index: 0, kind: input, shape index: {}]   ;;  %s367_s1 = inlined_call_operand.hbm [shape: bf16[128,256], index: 1, kind: input, shape index: {}]   ;;  %s368_s2 = inlined_call_operand.vmem [shape: f32[1,256], index: 2, kind: input, shape index: {}]   ;;  %s369_s3 = inlined_call_operand.vmem [shape: f32[16,128], index: 3, kind: output, shape index: {}]  }
   0x1   :  { %s16_s13 = sshll.u32 %s318_s12, 4  ;;  %s294_s16 = scalar_lea.hbm %s367_s1, 2048  ;;  %s17_s13 = int_to_ptr.vmem [resolvable:$true] %s16_s13 }
   0x2   :  { %p295_p0 = scmp.ne.s32.totalorder %s367_s1, %s294_s16  ;;  %p298_p1 = scmp.lt.u32.totalorder %s294_s16, %s367_s1 }
   0x4   :  { %p300_p2 = pnand %p298_p1, %p295_p0 }
   0x6   :  { %303 = shalt.err (!%p300_p2)
}
   0x7   :  { %s304_s21 = scalar_lea.vmem %s17_s13, 2048  ;;  %p309_p4 = scmp.lt.s32.totalorder %s17_s13, %s17_s13 }
   0x8   :  { %p305_p3 = scmp.ne.s32.totalorder %s17_s13, %s304_s21  ;;  %p310_p5 = scmp.lt.s32.totalorder %s304_s21, %s304_s21 }
   0xa   :  { %p311_p6 = por %p310_p5, %p309_p4 }
   0xc   :  { %p312_p7 = pnand %p311_p6, %p305_p3 }
   0xe   :  { %315 = shalt.err (!%p312_p7)
}
   0xf   :  { %s319_s22 = smov 128   ;;  %s320_s23 = smov 8  }
  0x10   :  { %22 = dma.hbm_to_vmem [thread:$0]  %s367_s1, 2048, %s17_s13, [#allocation4], %s319_s22, %s319_s22, %s320_s23  }
  0x11   :  { %316 = dma.done.wait [#allocation4], 2048  }
  0x12   :  { %317 = vsyncadd [#allocation4], 4294965248  ;;  %v321_v0 = vmov 0   ;;  %v261_v1 = vld [vmem:[#allocation3 + $0x4] ss:$8 sps:$4 sm:$0xff]   ;;  %v35_v18 = vlaneseq }
  0x13   :  { %189 = vmatprep.mubr.bf16.mxu0 %v321_v0  ;;  %v263_v2 = vld [vmem:[#allocation3] ss:$8 sps:$4 sm:$0xff]   ;;  %157 = vmatprep.subr.bf16.mxu0 %v261_v1  ;;  %v264_v3 = vld [vmem:[#allocation3 + $0x14] ss:$8 sps:$4 sm:$0xff]   ;;  %v266_v4 = vld [vmem:[#allocation3 + $0x10] ss:$8 sps:$4 sm:$0xff]  }
  0x14   :  { %158 = vmatpush1.bf16.msra.mxu0 %v263_v2  ;;  %v267_v5 = vld [vmem:[#allocation3 + $0x24] ss:$8 sps:$4 sm:$0xff]   ;;  %v269_v6 = vld [vmem:[#allocation3 + $0x20] ss:$8 sps:$4 sm:$0xff]   ;;  %v270_v7 = vld [vmem:[#allocation3 + $0x34] ss:$8 sps:$4 sm:$0xff]  }
  0x15   :  { %159 = vmatprep.subr.bf16.mxu0 %v264_v3  ;;  %v272_v8 = vld [vmem:[#allocation3 + $0x30] ss:$8 sps:$4 sm:$0xff]   ;;  %v273_v9 = vld [vmem:[#allocation3 + $0x44] ss:$8 sps:$4 sm:$0xff]   ;;  %v275_v10 = vld [vmem:[#allocation3 + $0x40] ss:$8 sps:$4 sm:$0xff]  }
  0x16   :  { %v276_v11 = vld [vmem:[#allocation3 + $0x54] ss:$8 sps:$4 sm:$0xff]   ;;  %v278_v12 = vld [vmem:[#allocation3 + $0x50] ss:$8 sps:$4 sm:$0xff]   ;;  %v279_v13 = vld [vmem:[#allocation3 + $0x64] ss:$8 sps:$4 sm:$0xff]  }
  0x17   :  { %v281_v14 = vld [vmem:[#allocation3 + $0x60] ss:$8 sps:$4 sm:$0xff]   ;;  %v282_v15 = vld [vmem:[#allocation3 + $0x74] ss:$8 sps:$4 sm:$0xff]   ;;  %v284_v16 = vld [vmem:[#allocation3 + $0x70] ss:$8 sps:$4 sm:$0xff]  }
  0x18   :  { %160 = vmatpush1.bf16.msra.mxu0 %v266_v4  ;;  %v285_v17 = vld [vmem:[%s366_s0] sm:$0xff]   ;;  %v36_v19 = vshrl.u32 %v35_v18, 7 }
  0x19   :  { %161 = vmatprep.subr.bf16.mxu0 %v267_v5  ;;  %v33_v21 = vld [vmem:[%s368_s2] sm:$0x3] }
  0x1a   :  { %v37_v20 = vsub.s32 0, %v36_v19  ;;  %v41_v32 = vsub.s32 1, %v36_v19 }
  0x1c   :  { %162 = vmatpush1.bf16.msra.mxu0 %v269_v6  ;;  %v38_v22 = vrot.slane %v33_v21, %v37_v20  ;;  %v42_v36 = vrot.slane %v33_v21, %v41_v32 }
  0x1d   :  { %163 = vmatprep.subr.bf16.mxu0 %v270_v7 }
  0x20   :  { %164 = vmatpush1.bf16.msra.mxu0 %v272_v8 }
  0x21   :  { %165 = vmatprep.subr.bf16.mxu0 %v273_v9 }
  0x24   :  { %166 = vmatpush1.bf16.msra.mxu0 %v275_v10 }
  0x25   :  { %167 = vmatprep.subr.bf16.mxu0 %v276_v11 }
  0x28   :  { %168 = vmatpush1.bf16.msra.mxu0 %v278_v12 }
  0x29   :  { %169 = vmatprep.subr.bf16.mxu0 %v279_v13 }
  0x2c   :  { %170 = vmatpush1.bf16.msra.mxu0 %v281_v14 }
  0x2d   :  { %171 = vmatprep.subr.bf16.mxu0 %v282_v15 }
  0x30   :  { %172 = vmatpush1.bf16.msra.mxu0 %v284_v16 }
  0x33   :  { %190 = vmatmul.mubr.bf16.vlgmr.msra.gmra.mrb[0].mxu0 %v285_v17 }
 0x106   :  { %v191_v23 = vpop.f32.mrb[0].mxu0 }
 0x107   :  { %v200_v24 = vadd.f32 %v191_v23, %v38_v22  ;;  %v193_v25 = vpop.f32.mrb[1].mxu0 }
 0x108   :  { %v195_v26 = vpop.f32.mrb[2].mxu0  ;;  %v201_v37 = vadd.f32 %v193_v25, %v42_v36 }
 0x109   :  { %v255_v27 = vmul.f32 -1.442695, %v200_v24  ;;  %v202_v28 = vadd.f32 %v195_v26, %v38_v22  ;;  %v197_v29 = vpop.f32.mrb[3].mxu0 }
 0x10a   :  { %v203_v38 = vadd.f32 %v197_v29, %v42_v36  ;;  %v227_v39 = vmax.f32 %v201_v37, 0.0 }
 0x10b   :  { %286 = vpow2.f32 %v255_v27  ;;  %v256_v30 = vmul.f32 -1.442695, %v202_v28 }
 0x10c   :  { %v228_v42 = vmax.f32 %v203_v38, 0.0 }
 0x10d   :  { %288 = vpow2.f32 %v256_v30 }
 0x115   :  { %v287_v31 = vpop.eup %286 }
 0x116   :  { %v221_v33 = vadd.f32 1.0, %v287_v31 }
 0x117   :  { %v289_v34 = vpop.eup %288 }
 0x118   :  { %290 = vrcp.f32 %v221_v33  ;;  %v222_v35 = vadd.f32 1.0, %v289_v34 }
 0x11a   :  { %292 = vrcp.f32 %v222_v35 }
 0x122   :  { %v291_v40 = vpop.eup %290 }
 0x123   :  { %v229_v41 = vmul.f32 %v291_v40, %v227_v39 }
 0x124   :  { %v293_v43 = vpop.eup %292 }
 0x125   :  { %231 = vst [vmem:[%s369_s3] sm:$0xff] %v229_v41  ;;  %v230_v44 = vmul.f32 %v293_v43, %v228_v42 }
 0x127   :  { %232 = vst [vmem:[%s369_s3 + $0x8] sm:$0xff] %v230_v44 }
 0x128   :  { %237 = vsyncpa [#allocation4], 1 }

</bundles_post_ra>
